<compile_context>
chip_gen: v5e
topology: v5e:2x2
jax: 0.10.0
libtpu: 0.0.40
codegen_flags: <defaults>
</compile_context>

<pallas_src>
import functools

import jax
import jax.numpy as jnp
from jax.experimental import pallas as pl
from jax.experimental.pallas import tpu as pltpu


def _vit_mae_output_kernel(x_ref, w_ref, b_ref, res_ref, o_ref):
    """One (tm, tn) output tile: full-K matmul + bias + residual epilogue.

    x_ref: (tm, K) activations; w_ref: (K, tn) weight (bf16, resident);
    b_ref: (1, tn) bias (f32); res_ref / o_ref: (tm, tn).
    """
    x = x_ref[...].astype(w_ref.dtype)  # bf16 operands for the MXU
    acc = jnp.dot(x, w_ref[...], preferred_element_type=jnp.float32)
    out = acc + b_ref[...] + res_ref[...].astype(jnp.float32)
    # TODO(synk): training-mode dropout (pltpu.prng_random_bits mask) is not
    # implemented; eval-mode dropout is the identity.
    o_ref[...] = out.astype(o_ref.dtype)


def _pick_tile(dim, preferred, align):
    """Pick a tile size for `dim`.

    Returns the full dim if it fits in one tile; otherwise prefers the
    largest `align`-multiple divisor of `dim` that is <= preferred (so every
    grid block is full / unmasked), falling back to an `align`-multiple tile
    with a padded last block.
    """
    if dim <= preferred:
        return dim
    best = 0
    cap = (preferred // align) * align
    t = align
    while t <= cap:
        if dim % t == 0:
            best = t
        t += align
    if best:
        return best
    return max(align, cap)


@functools.partial(jax.jit, static_argnames=("tm", "tn"))
def vit_mae_output(hidden_states, input_tensor, weight_t, bias, *, tm=256, tn=None):
    """hidden_states: [B, S, I]; input_tensor: [B, S, H];
    weight_t: [I, H] (pre-transposed, ideally bf16); bias: [H]."""
    B, S, I = hidden_states.shape
    H = input_tensor.shape[-1]
    M, K, N = B * S, I, H

    x = hidden_states.reshape(M, K)
    res = input_tensor.reshape(M, N)
    b = bias.reshape(1, N).astype(jnp.float32)
    out_dtype = hidden_states.dtype

    # Tile selection: 8-aligned row tiles, 128-aligned (lane-dense) col tiles,
    # or the full dim when it is small enough to live in one block.
    tm_eff = _pick_tile(M, tm, 8)
    tn_pref = tn if tn is not None else min(N, 1024)
    tn_eff = _pick_tile(N, tn_pref, 128)
    grid = (pl.cdiv(M, tm_eff), pl.cdiv(N, tn_eff))

    # Residual is read exactly once per output tile and fully overwritten, so
    # it can share HBM with the output when dtypes match.
    io_aliases = {3: 0} if res.dtype == out_dtype else {}

    bytes_accessed = (
        x.size * x.dtype.itemsize
        + weight_t.size * weight_t.dtype.itemsize
        + b.size * 4
        + res.size * res.dtype.itemsize
        + M * N * jnp.dtype(out_dtype).itemsize
    )
    cost = pl.CostEstimate(
        flops=2 * M * K * N, transcendentals=0, bytes_accessed=bytes_accessed
    )

    out = pl.pallas_call(
        _vit_mae_output_kernel,
        out_shape=jax.ShapeDtypeStruct((M, N), out_dtype),
        grid_spec=pltpu.PrefetchScalarGridSpec(
            num_scalar_prefetch=0,
            grid=grid,
            in_specs=[
                pl.BlockSpec((tm_eff, K), lambda i, j: (i, 0)),       # activations
                pl.BlockSpec((K, tn_eff), lambda i, j: (0, j)),       # weight (resident)
                pl.BlockSpec((1, tn_eff), lambda i, j: (0, j)),       # bias
                pl.BlockSpec((tm_eff, tn_eff), lambda i, j: (i, j)),  # residual
            ],
            out_specs=pl.BlockSpec((tm_eff, tn_eff), lambda i, j: (i, j)),
        ),
        compiler_params=pltpu.CompilerParams(
            dimension_semantics=("parallel", "parallel"),
            vmem_limit_bytes=48 * 1024 * 1024,  # > v5e/v6e 16/32 MiB defaults, < v7x 64 MiB physical
        ),
        input_output_aliases=io_aliases,
        cost_estimate=cost,
    )(x, weight_t, b, res)

    return out.reshape(B, S, N)


if __name__ == "__main__":
    # Small ViT-MAE-like config.
    batch, seq = 2, 8
    hidden_size = 32
    intermediate_size = 128  # 4 * hidden_size

    key = jax.random.PRNGKey(0)
    k1, k2, k3, k4 = jax.random.split(key, 4)

    hidden_states = jax.random.normal(
        k1, (batch, seq, intermediate_size), dtype=jnp.float32
    )
    input_tensor = jax.random.normal(
        k2, (batch, seq, hidden_size), dtype=jnp.float32
    )
    # Deterministic "Linear" params (torch convention: weight [out, in]).
    weight = (
        jax.random.normal(k3, (hidden_size, intermediate_size), dtype=jnp.float32)
        * 0.02
    )
    bias = jax.random.normal(k4, (hidden_size,), dtype=jnp.float32) * 0.02

    # One-time parameter prep OUTSIDE the jitted forward: transpose to the
    # kernel-ready [I, H] layout and cast to bf16 for the MXU.
    weight_t = jnp.asarray(weight.T, dtype=jnp.bfloat16)

    out = vit_mae_output(hidden_states, input_tensor, weight_t, bias)
    out = jax.block_until_ready(out)
    assert out.shape == (batch, seq, hidden_size)

    # Reference using the same bf16-operand / f32-accumulate matmul.
    xb = hidden_states.reshape(-1, intermediate_size).astype(jnp.bfloat16)
    ref = (
        jnp.dot(xb, weight_t, preferred_element_type=jnp.float32)
        + bias[None, :]
        + input_tensor.reshape(-1, hidden_size)
    ).reshape(batch, seq, hidden_size)
    assert jnp.allclose(out, ref, atol=1e-4, rtol=1e-4)

    # Sanity check against full-f32 math (loose tolerance for bf16 rounding).
    ref_f32 = hidden_states @ weight.T + bias + input_tensor
    assert jnp.allclose(out, ref_f32, atol=5e-2, rtol=5e-2)

    print("KERNEL_OK")
</pallas_src>

<mosaic_0001>
module attributes {stable_mosaic.version = 11 : i64} {
  func.func @_vit_mae_output_kernel(%arg0: i32, %arg1: i32, %arg2: memref<16x128xf32, #tpu.memory_space<vmem>>, %arg3: memref<128x32xbf16, #tpu.memory_space<vmem>>, %arg4: memref<1x32xf32, #tpu.memory_space<vmem>>, %arg5: memref<16x32xf32, #tpu.memory_space<vmem>>, %arg6: memref<16x32xf32, #tpu.memory_space<vmem>>) attributes {dimension_semantics = [#tpu.dimension_semantics<parallel>, #tpu.dimension_semantics<parallel>], iteration_bounds = array<i64: 1, 1>, scalar_prefetch = 0 : i64, scratch_operands = 0 : i64, tpu.core_type = #tpu.core_type<tc>, window_params = [{transform_indices = @transform_0, window_bounds = array<i64: 16, 128>}, {transform_indices = @transform_1, window_bounds = array<i64: 128, 32>}, {transform_indices = @transform_2, window_bounds = array<i64: 1, 32>}, {transform_indices = @transform_3, window_bounds = array<i64: 16, 32>}, {transform_indices = @transform_4, window_bounds = array<i64: 16, 32>}]} {
    %c0 = arith.constant 0 : index
    %c0_0 = arith.constant 0 : index
    %0 = vector.load %arg2[%c0, %c0_0] : memref<16x128xf32, #tpu.memory_space<vmem>>, vector<16x128xf32>
    %1 = arith.truncf %0 : vector<16x128xf32> to vector<16x128xbf16>
    %c0_1 = arith.constant 0 : index
    %c0_2 = arith.constant 0 : index
    %2 = vector.load %arg3[%c0_1, %c0_2] : memref<128x32xbf16, #tpu.memory_space<vmem>>, vector<128x32xbf16>
    %cst = arith.constant dense<0.000000e+00> : vector<16x32xf32>
    %3 = tpu.matmul %1, %2, %cst {dimension_numbers = #tpu.dot_dimension_numbers<[1], [0], [0], [1], [0, 0, 1, 1], [], []>} : vector<16x128xbf16>, vector<128x32xbf16>, vector<16x32xf32> -> vector<16x32xf32>
    %c0_3 = arith.constant 0 : index
    %c0_4 = arith.constant 0 : index
    %4 = vector.load %arg4[%c0_3, %c0_4] : memref<1x32xf32, #tpu.memory_space<vmem>>, vector<1x32xf32>
    %5 = vector.broadcast %4 : vector<1x32xf32> to vector<16x32xf32>
    %6 = arith.addf %3, %5 : vector<16x32xf32>
    %c0_5 = arith.constant 0 : index
    %c0_6 = arith.constant 0 : index
    %7 = vector.load %arg5[%c0_5, %c0_6] : memref<16x32xf32, #tpu.memory_space<vmem>>, vector<16x32xf32>
    %8 = arith.addf %6, %7 : vector<16x32xf32>
    %c0_7 = arith.constant 0 : index
    %c0_8 = arith.constant 0 : index
    %9 = vector.load %arg6[%c0_7, %c0_8] : memref<16x32xf32, #tpu.memory_space<vmem>>, vector<16x32xf32>
    tpu.vector_store %arg6[%c0_7, %c0_8], %8 {strides = array<i32>} : memref<16x32xf32, #tpu.memory_space<vmem>>, vector<16x32xf32>,
    return
  }
  func.func @transform_0(%arg0: i32, %arg1: i32) -> (i32, i32) {
    %c0_i32 = arith.constant 0 : i32
    %c0_i32_0 = arith.constant 0 : i32
    return %arg0, %c0_i32 : i32, i32
  }
  func.func @transform_1(%arg0: i32, %arg1: i32) -> (i32, i32) {
    %c0_i32 = arith.constant 0 : i32
    %c0_i32_0 = arith.constant 0 : i32
    return %c0_i32, %arg1 : i32, i32
  }
  func.func @transform_2(%arg0: i32, %arg1: i32) -> (i32, i32) {
    %c0_i32 = arith.constant 0 : i32
    %c0_i32_0 = arith.constant 0 : i32
    return %c0_i32, %arg1 : i32, i32
  }
  func.func @transform_3(%arg0: i32, %arg1: i32) -> (i32, i32) {
    %c0_i32 = arith.constant 0 : i32
    return %arg0, %arg1 : i32, i32
  }
  func.func @transform_4(%arg0: i32, %arg1: i32) -> (i32, i32) {
    %c0_i32 = arith.constant 0 : i32
    return %arg0, %arg1 : i32, i32
  }
}

</mosaic_0001>

<bundles_post_ra>
// kernel: vit_mae_output.1
= control target key start
LH: loop header
LB: loop body
LE: loop exit
PB: predicated region body
PF: predicated region fallthrough
CT: control target
= control target key end

     0   :  { %vm106_vm0 = vcmask 261120   ;;  %s224_s1 = inlined_call_operand.vmem [shape: bf16[128,32], index: 1, kind: input, shape index: {}]   ;;  %s225_s2 = inlined_call_operand.vmem [shape: f32[1,32], index: 2, kind: input, shape index: {}]   ;;  %s226_s0 = inlined_call_operand.vmem [shape: f32[16,128], index: 0, kind: input, shape index: {}]   ;;  %s227_s3 = inlined_call_operand.vmem [shape: f32[16,32], index: 3, kind: input, shape index: {}, may-alias: {3,4}]   ;;  %s228_s4 = inlined_call_operand.vmem [shape: f32[16,32], index: 4, kind: output, shape index: {}, may-alias: {3,4}]  }
   0x1   :  { %v152_v0 = vld [vmem:[%s224_s1 + $0x38] sm:$0xff]  ;;  %v151_v1 = vld [vmem:[%s224_s1 + $0x30] sm:$0xff]  ;;  %v150_v2 = vld [vmem:[%s224_s1 + $0x28] sm:$0xff] }
   0x2   :  { %88 = vmatpush.bf16.msra.mxu0 %v152_v0  ;;  %v149_v3 = vld [vmem:[%s224_s1 + $0x20] sm:$0xff]  ;;  %v148_v4 = vld [vmem:[%s224_s1 + $0x18] sm:$0xff]  ;;  %v147_v5 = vld [vmem:[%s224_s1 + $0x10] sm:$0xff] }
   0x3   :  { %v146_v6 = vld [vmem:[%s224_s1 + $0x8] sm:$0xff]  ;;  %v145_v7 = vld [vmem:[%s224_s1] sm:$0xff] }
   0x4   :  { %v17_v8 = vld [vmem:[%s226_s0] sm:$0xff]  ;;  %v18_v9 = vld [vmem:[%s226_s0 + $0x8] sm:$0xff] }
   0x5   :  { %v19_v10 = vpack.c.bf16 %v18_v9, %v17_v8  ;;  %v153_v11 = vld [vmem:[%s225_s2] ss:$0 sm:$0xff] }
   0x6   :  { %89 = vmatpush.bf16.msra.mxu0 %v151_v1  ;;  %v102_v13 = vld [vmem:[%s227_s3] sm:$0xff] }
   0xa   :  { %90 = vmatpush.bf16.msra.mxu0 %v150_v2 }
   0xe   :  { %91 = vmatpush.bf16.msra.mxu0 %v149_v3 }
  0x12   :  { %92 = vmatpush.bf16.msra.mxu0 %v148_v4 }
  0x16   :  { %93 = vmatpush.bf16.msra.mxu0 %v147_v5 }
  0x1a   :  { %94 = vmatpush.bf16.msra.mxu0 %v146_v6 }
  0x1e   :  { %95 = vmatpush.bf16.msra.mxu0 %v145_v7 }
  0x21   :  { %96 = vmatmul.bf16.vlgmr.msra.gmra.mxu0 %v19_v10 }
  0x9e   :  { %v97_v12 = vpop.f32.mrf.mxu0 }
  0x9f   :  { %v98_v14 = vadd.f32 %v153_v11, %v97_v12 }
  0xa1   :  { %v104_v15 = vadd.f32 %v102_v13, %v98_v14 }
  0xa3   :  { %107 = vst.msk [vmem:[%s228_s4] sm:$0xff] %vm106_vm0, %v104_v15 }
  0xa6   :  { %v99_v16 = vpop.f32.mrf.mxu0 }
  0xa7   :  { %v100_v18 = vadd.f32 %v153_v11, %v99_v16 }
  0xaa   :  { %v103_v17 = vld [vmem:[%s227_s3 + $0x8] sm:$0xff] }
  0xab   :  { %v105_v19 = vadd.f32 %v103_v17, %v100_v18 }
  0xad   :  { %108 = vst.msk [vmem:[%s228_s4 + $0x8] sm:$0xff] %vm106_vm0, %v105_v19 }

</bundles_post_ra>
